<compile_context>
chip_gen: v7x
topology: tpu7x:2x2x1
jax: 0.10.0
libtpu: 0.0.40
codegen_flags: <defaults>
</compile_context>

<pallas_src>
import functools

import jax
import jax.numpy as jnp
from jax.experimental import pallas as pl
from jax.experimental.pallas import tpu as pltpu


def _bhattacharyya_kernel(x_ref, tgt_ref, tbl_ref, out_ref, *,
                          n_valid, swap_contract, mask_needed):
    j = pl.program_id(0)

    x = x_ref[...].astype(jnp.float32)                       # [C, TN] logits
    tn = x.shape[1]

    # softmax via half-exponent: p = h^2 / sum_c(h^2), h = exp((x - m) / 2)
    m = jnp.max(x, axis=0, keepdims=True)                    # [1, TN]
    h = jnp.exp((x - m) * 0.5)                                # [C, TN]
    denom = jnp.sum(h * h, axis=0, keepdims=True)             # [1, TN]

    tgt = tgt_ref[...]                                        # [1, TN] int32

    if swap_contract:
        # C >> K: contract over C on the MXU, then a cheap K-length select-sum.
        k = tbl_ref.shape[0]
        s = jnp.dot(tbl_ref[...], h,
                    preferred_element_type=jnp.float32)       # [K, TN]
        k_ids = jax.lax.broadcasted_iota(jnp.int32, (k, tn), 0)
        num = jnp.sum(jnp.where(k_ids == tgt, s, 0.0),
                      axis=0, keepdims=True)                  # [1, TN]
    else:
        # Small C: rebuild sqrt(q)[:, tile] from the tiny class table on the MXU.
        k = tbl_ref.shape[1]
        k_ids = jax.lax.broadcasted_iota(jnp.int32, (k, tn), 0)
        one_hot = (k_ids == tgt).astype(jnp.float32)          # [K, TN]
        sqrt_q = jnp.dot(tbl_ref[...], one_hot,
                         preferred_element_type=jnp.float32)  # [C, TN]
        num = jnp.sum(h * sqrt_q, axis=0, keepdims=True)      # [1, TN]

    # sum_c sqrt(p*q) = num / sqrt(denom)  =>  -log(.) = 0.5*log(denom) - log(num)
    bc = 0.5 * jnp.log(denom) - jnp.log(num)                  # [1, TN]

    if mask_needed:
        last = pl.num_programs(0) - 1

        @pl.when(j == last)
        def _():
            col = j * tn + jax.lax.broadcasted_iota(jnp.int32, (1, tn), 1)
            bc_m = jnp.where(col < n_valid, bc, 0.0)
            out_ref[...] = jnp.sum(bc_m, axis=1, keepdims=True).reshape(1, 1, 1)

        @pl.when(j != last)
        def _():
            out_ref[...] = jnp.sum(bc, axis=1, keepdims=True).reshape(1, 1, 1)
    else:
        out_ref[...] = jnp.sum(bc, axis=1, keepdims=True).reshape(1, 1, 1)


def _vmem_budget_bytes():
    """Generation-aware VMEM limit: ~45 MiB on v7x (64 MiB phys), 80 MiB on v5e/v6e."""
    phys = 64 * 1024 * 1024  # conservative fallback (v7x per-TC physical)
    try:
        info = pltpu.get_tpu_info()
        cap = getattr(info, "vmem_capacity_bytes", None)
        if cap:
            phys = int(cap)
    except Exception:
        pass
    return int(min(int(phys * 0.7), 80 * 1024 * 1024))


def _choose_tile_n(C, N, in_itemsize, vmem_limit):
    """Largest lane tile (multiple of 128) keeping total live VMEM inside budget.

    Accounts for the input double-buffer at its real itemsize, ~4 f32 in-kernel
    temporaries per element (x cast, h, gathered sqrt_q / MXU result, fusion
    slack) and the int32 target double-buffer.
    """
    n_buf = 2
    bytes_per_col = C * (n_buf * in_itemsize + 4 * 4) + n_buf * 4
    budget = int(vmem_limit * 0.8)
    cols = max(budget // bytes_per_col, 128)
    if N <= cols:
        return int(N)                 # single full-width block is always legal
    tn = (cols // 128) * 128
    return int(min(max(tn, 128), 32768))


def bhattacharyya_loss(inp, target, target_distribution):
    """inp: [C, N] logits, target: [N] int class ids, target_distribution: [K, C]."""
    C, N = inp.shape
    K = target_distribution.shape[0]

    # __init__ glue (tiny [K, C] table, done once in plain JAX):
    q_table = jax.nn.softmax(target_distribution.astype(jnp.float32), axis=0)  # [K, C]
    sqrt_q = jnp.sqrt(q_table)                                                  # [K, C]

    swap_contract = C >= 4 * K
    tbl = sqrt_q if swap_contract else sqrt_q.T       # [K, C] or [C, K]

    target2d = target.astype(jnp.int32).reshape(1, N)

    in_itemsize = jnp.dtype(inp.dtype).itemsize
    vmem_limit = _vmem_budget_bytes()
    tn = _choose_tile_n(C, N, in_itemsize, vmem_limit)
    num_tiles = pl.cdiv(N, tn)
    mask_needed = (N % tn) != 0

    kernel = functools.partial(
        _bhattacharyya_kernel,
        n_valid=N, swap_contract=swap_contract, mask_needed=mask_needed)

    x_spec_kwargs = {}
    if num_tiles > 1 and tn <= 256:
        # Very large C forces narrow tiles; deepen prefetch to hide DMA latency.
        x_spec_kwargs["pipeline_mode"] = pl.Buffered(3)

    out = pl.pallas_call(
        kernel,
        grid=(num_tiles,),
        in_specs=[
            pl.BlockSpec((C, tn), lambda j: (0, j), **x_spec_kwargs),  # logits tile
            pl.BlockSpec((1, tn), lambda j: (0, j)),                   # targets tile
            pl.BlockSpec(tbl.shape, lambda j: (0, 0)),                 # sqrt(q) table
        ],
        out_specs=pl.BlockSpec((1, 1, 1), lambda j: (j, 0, 0)),        # per-tile partial
        out_shape=jax.ShapeDtypeStruct((num_tiles, 1, 1), jnp.float32),
        compiler_params=pltpu.CompilerParams(
            dimension_semantics=("parallel",),   # independent partial sums
            vmem_limit_bytes=vmem_limit,
        ),
    )(inp, target2d, tbl)
    return jnp.sum(out)


def _reference(inp, target, target_distribution):
    q_table = jax.nn.softmax(target_distribution.astype(jnp.float32), axis=0)
    q = q_table[target.astype(jnp.int32)].T
    p = jax.nn.softmax(inp.astype(jnp.float32), axis=0)
    spq = jnp.sum(jnp.sqrt(p * q), axis=0)
    return jnp.sum(-jnp.log(spq))


if __name__ == "__main__":
    key = jax.random.PRNGKey(0)
    k1, k2, k3 = jax.random.split(key, 3)

    C, N, K = 8, 16, 6   # channels, samples, num classes
    inp = jax.random.normal(k1, (C, N), dtype=jnp.float32)
    target = jax.random.randint(k2, (N,), 0, K, dtype=jnp.int32)
    target_distribution = jax.random.normal(k3, (K, C), dtype=jnp.float32)

    loss = bhattacharyya_loss(inp, target, target_distribution)
    jax.block_until_ready(loss)

    ref = _reference(inp, target, target_distribution)
    assert jnp.allclose(loss, ref, rtol=1e-5, atol=1e-5), (loss, ref)

    print("KERNEL_OK")
</pallas_src>

<mosaic_0001>
module attributes {stable_mosaic.version = 11 : i64} {
  func.func @_bhattacharyya_kernel(%arg0: i32, %arg1: memref<8x16xf32, #tpu.memory_space<vmem>>, %arg2: memref<1x16xi32, #tpu.memory_space<vmem>>, %arg3: memref<8x6xf32, #tpu.memory_space<vmem>>, %arg4: memref<1x1x1xf32, #tpu.memory_space<vmem>>) attributes {dimension_semantics = [#tpu.dimension_semantics<parallel>], iteration_bounds = array<i64: 1>, scalar_prefetch = 0 : i64, scratch_operands = 0 : i64, tpu.core_type = #tpu.core_type<tc>, window_params = [{transform_indices = @transform_0, window_bounds = array<i64: 8, 16>}, {transform_indices = @transform_1, window_bounds = array<i64: 1, 16>}, {pipeline_mode = #tpu.pipeline_mode<synchronous>, transform_indices = @transform_2, window_bounds = array<i64: 8, 6>}, {transform_indices = @transform_3, window_bounds = array<i64: 1, 1, 1>}]} {
    %c0 = arith.constant 0 : index
    %c0_0 = arith.constant 0 : index
    %0 = vector.load %arg1[%c0, %c0_0] : memref<8x16xf32, #tpu.memory_space<vmem>>, vector<8x16xf32>
    %cst = arith.constant dense<0xFF800000> : vector<16xf32>
    %1 = vector.multi_reduction <maximumf>, %0, %cst [0] : vector<8x16xf32> to vector<16xf32>
    %2 = vector.shape_cast %1 : vector<16xf32> to vector<1x16xf32>
    %3 = vector.broadcast %2 : vector<1x16xf32> to vector<8x16xf32>
    %4 = arith.subf %0, %3 : vector<8x16xf32>
    %cst_1 = arith.constant 5.000000e-01 : f32
    %5 = vector.broadcast %cst_1 : f32 to vector<8x16xf32>
    %6 = arith.mulf %4, %5 : vector<8x16xf32>
    %7 = math.exp %6 : vector<8x16xf32>
    %8 = arith.mulf %7, %7 : vector<8x16xf32>
    %cst_2 = arith.constant dense<0.000000e+00> : vector<16xf32>
    %9 = vector.multi_reduction <add>, %8, %cst_2 [0] : vector<8x16xf32> to vector<16xf32>
    %10 = vector.shape_cast %9 : vector<16xf32> to vector<1x16xf32>
    %c0_3 = arith.constant 0 : index
    %c0_4 = arith.constant 0 : index
    %11 = vector.load %arg2[%c0_3, %c0_4] : memref<1x16xi32, #tpu.memory_space<vmem>>, vector<1x16xi32>
    %12 = tpu.iota {dimensions = array<i32: 0>} : vector<6x16xi32>
    %13 = vector.broadcast %11 : vector<1x16xi32> to vector<6x16xi32>
    %14 = arith.cmpi eq, %12, %13 : vector<6x16xi32>
    %15 = arith.extui %14 : vector<6x16xi1> to vector<6x16xi32>
    %16 = arith.sitofp %15 : vector<6x16xi32> to vector<6x16xf32>
    %c0_5 = arith.constant 0 : index
    %c0_6 = arith.constant 0 : index
    %17 = vector.load %arg3[%c0_5, %c0_6] : memref<8x6xf32, #tpu.memory_space<vmem>>, vector<8x6xf32>
    %cst_7 = arith.constant dense<0.000000e+00> : vector<8x16xf32>
    %18 = tpu.matmul %17, %16, %cst_7 {dimension_numbers = #tpu.dot_dimension_numbers<[1], [0], [0], [1], [0, 0, 1, 1], [], []>} : vector<8x6xf32>, vector<6x16xf32>, vector<8x16xf32> -> vector<8x16xf32>
    %19 = arith.mulf %7, %18 : vector<8x16xf32>
    %cst_8 = arith.constant dense<0.000000e+00> : vector<16xf32>
    %20 = vector.multi_reduction <add>, %19, %cst_8 [0] : vector<8x16xf32> to vector<16xf32>
    %21 = vector.shape_cast %20 : vector<16xf32> to vector<1x16xf32>
    %22 = math.log %10 : vector<1x16xf32>
    %cst_9 = arith.constant 5.000000e-01 : f32
    %23 = vector.broadcast %cst_9 : f32 to vector<1x16xf32>
    %24 = arith.mulf %23, %22 : vector<1x16xf32>
    %25 = math.log %21 : vector<1x16xf32>
    %26 = arith.subf %24, %25 : vector<1x16xf32>
    %cst_10 = arith.constant dense<0.000000e+00> : vector<1xf32>
    %27 = vector.multi_reduction <add>, %26, %cst_10 [1] : vector<1x16xf32> to vector<1xf32>
    %28 = vector.shape_cast %27 : vector<1xf32> to vector<1x1xf32>
    %29 = vector.shape_cast %28 : vector<1x1xf32> to vector<1x1x1xf32>
    %c0_11 = arith.constant 0 : index
    %c0_12 = arith.constant 0 : index
    %c0_13 = arith.constant 0 : index
    %30 = vector.load %arg4[%c0_11, %c0_12, %c0_13] : memref<1x1x1xf32, #tpu.memory_space<vmem>>, vector<1x1x1xf32>
    tpu.vector_store %arg4[%c0_11, %c0_12, %c0_13], %29 {strides = array<i32>} : memref<1x1x1xf32, #tpu.memory_space<vmem>>, vector<1x1x1xf32>,
    return
  }
  func.func @transform_0(%arg0: i32) -> (i32, i32) {
    %c0_i32 = arith.constant 0 : i32
    %c0_i32_0 = arith.constant 0 : i32
    return %c0_i32, %arg0 : i32, i32
  }
  func.func @transform_1(%arg0: i32) -> (i32, i32) {
    %c0_i32 = arith.constant 0 : i32
    %c0_i32_0 = arith.constant 0 : i32
    return %c0_i32, %arg0 : i32, i32
  }
  func.func @transform_2(%arg0: i32) -> (i32, i32) {
    %c0_i32 = arith.constant 0 : i32
    %c0_i32_0 = arith.constant 0 : i32
    %c0_i32_1 = arith.constant 0 : i32
    return %c0_i32, %c0_i32_0 : i32, i32
  }
  func.func @transform_3(%arg0: i32) -> (i32, i32, i32) {
    %c0_i32 = arith.constant 0 : i32
    %c0_i32_0 = arith.constant 0 : i32
    %c0_i32_1 = arith.constant 0 : i32
    return %arg0, %c0_i32, %c0_i32_0 : i32, i32, i32
  }
}

</mosaic_0001>

<bundles_post_ra>
// kernel: tpu_custom_call.1
= control target key start
LH: loop header
LB: loop body
LE: loop exit
PB: predicated region body
PF: predicated region fallthrough
CT: control target
= control target key end

     0   :  { %8 = vsyncpa [#allocation3], 0  ;;  %s346_s0 = inlined_call_operand.hbm [shape: f32[8,16], index: 0, kind: input, shape index: {}]   ;;  %s347_s1 = inlined_call_operand.vmem [shape: s32[1,16], index: 1, kind: input, shape index: {}]   ;;  %s348_s2 = inlined_call_operand.hbm [shape: f32[8,6], index: 2, kind: input, shape index: {}]   ;;  %s349_s3 = inlined_call_operand.hbm [shape: f32[1,1,1], index: 3, kind: output, shape index: {}]  }
   0x1   :  { %9 = vsyncpa [#allocation6], 0 }
   0x2   :  { %10 = vsyncpa [#allocation4], 0  ;;  %s278_s12 = smov [#allocation2]   ;;  %s279_s14 = smov [#allocation5]  }
   0x3   :  { %s17_s13 = sshll.u32 %s278_s12, 4  ;;  %s29_s15 = sshll.u32 %s279_s14, 4  ;;  %s18_s13 = int_to_ptr.vmem [resolvable:$true] %s17_s13  ;;  %s30_s15 = int_to_ptr.vmem [resolvable:$true] %s29_s15 }
   0x4   :  { %s206_s18 = scalar_lea.hbm %s346_s0, 128 }
   0x5   :  { %p207_p0 = scmp.ne.s32.totalorder %s346_s0, %s206_s18  ;;  %p210_p1 = scmp.lt.u32.totalorder %s206_s18, %s346_s0 }
   0x7   :  { %p212_p2 = pnand %p210_p1, %p207_p0 }
   0x9   :  { %215 = shalt.err (!%p212_p2)
}
   0xa   :  { %s216_s23 = scalar_lea.vmem %s18_s13, 128  ;;  %p221_p4 = scmp.lt.s32.totalorder %s18_s13, %s18_s13 }
   0xb   :  { %p217_p3 = scmp.ne.s32.totalorder %s18_s13, %s216_s23  ;;  %p222_p5 = scmp.lt.s32.totalorder %s216_s23, %s216_s23 }
   0xd   :  { %p223_p6 = por %p222_p5, %p221_p4 }
   0xf   :  { %p224_p7 = pnand %p223_p6, %p217_p3 }
  0x11   :  { %227 = shalt.err (!%p224_p7)
}
  0x12   :  { %20 = dma.hbm_to_vmem [thread:$0]  %s346_s0, 128, %s18_s13, [#allocation3]  }
  0x13   :  { %s228_s28 = scalar_lea.hbm %s348_s2, 128 }
  0x14   :  { %p229_p8 = scmp.ne.s32.totalorder %s348_s2, %s228_s28  ;;  %p232_p9 = scmp.lt.u32.totalorder %s228_s28, %s348_s2 }
  0x16   :  { %p234_p10 = pnand %p232_p9, %p229_p8 }
  0x18   :  { %237 = shalt.err (!%p234_p10)
}
  0x19   :  { %s238_s6 = scalar_lea.vmem %s30_s15, 128  ;;  %p243_p12 = scmp.lt.s32.totalorder %s30_s15, %s30_s15 }
  0x1a   :  { %p239_p11 = scmp.ne.s32.totalorder %s30_s15, %s238_s6  ;;  %p244_p13 = scmp.lt.s32.totalorder %s238_s6, %s238_s6 }
  0x1c   :  { %p245_p0 = por %p244_p13, %p243_p12 }
  0x1e   :  { %p246_p1 = pnand %p245_p0, %p239_p11 }
  0x20   :  { %249 = shalt.err (!%p246_p1)
}
  0x21   :  { %32 = dma.hbm_to_vmem [thread:$0]  %s348_s2, 128, %s30_s15, [#allocation6]  }
  0x22   :  { %272 = dma.done.wait [#allocation3], 128  }
  0x23   :  { %273 = vsyncadd [#allocation3], 4294967168 }
  0x24   :  { %274 = dma.done.wait [#allocation6], 128  }
  0x25   :  { %275 = vsyncadd [#allocation6], 4294967168  ;;  %v61_v0 = vlaneseq  ;;  %v280_v1 = vmov 0.0   ;;  %vm281_vm0 = vmmov 0   ;;  %v184_v3 = vld [vmem:[%s347_s1] ss:$0 sm:$0xff] }
  0x26   :  { %190 = vmatprep.subr.mxu0 %v280_v1  ;;  %192 = vmatprep.mubr.msk.f32.mxu0 %vm281_vm0, %v280_v1  ;;  %vm75_vm1 = vcmask 1045504   ;;  %v70_v4 = vld [vmem:[#allocation5] sm:$0xff]  ;;  %vm71_vm3 = vcmask 48128   ;;  %v39_v6 = vld [vmem:[#allocation2] sm:$0xff]  ;;  %vm40_vm4 = vcmask 130048   ;;  %s282_s1 = smov [#allocation7]  }
  0x27   :  { %v62_v2 = vshrl.u32 %v61_v0, 7  ;;  %v41_v7 = vsel %vm40_vm4, %v39_v6, -inf  ;;  %s174_s2 = sshll.u32 %s282_s1, 4  ;;  %vm166_vm5 = vcmask 0   ;;  %s175_s2 = int_to_ptr.vmem [resolvable:$true] %s174_s2 }
  0x28   :  { %v42_v8 = vrot.slane %v41_v7, 4  ;;  %s250_s10 = scalar_lea.vmem %s175_s2, 16  ;;  %s254_s11 = scalar_lea.vmem %s175_s2, 32 }
  0x29   :  { %vm67_vm2 = vcmp.eq.s32.totalorder %v62_v2, %v184_v3  ;;  %p251_p2 = scmp.ne.s32.totalorder %s175_s2, %s250_s10  ;;  %p255_p3 = scmp.lt.s32.totalorder %s175_s2, %s175_s2 }
  0x2a   :  { %v185_v5 = vsel %vm67_vm2, 1.0, %v280_v1  ;;  %v43_v9 = vmax.f32 %v41_v7, %v42_v8  ;;  %p256_p4 = scmp.lt.s32.totalorder %s254_s11, %s250_s10 }
  0x2b   :  { %191 = vmatpush3.msk.msra.mxu0 %vm75_vm1, %v185_v5 }
  0x2c   :  { %193 = vmatmul.mubr.msk.f32.vlgmr.msra.gmra.mrb[0].mxu0 %vm71_vm3, %v70_v4  ;;  %v44_v10 = vrot.slane %v43_v9, 2  ;;  %p257_p5 = por %p256_p4, %p255_p3 }
  0x2e   :  { %v45_v11 = vmax.f32 %v43_v9, %v44_v10  ;;  %p258_p6 = pnand %p257_p5, %p251_p2 }
  0x30   :  { %v46_v12 = vrot.slane %v45_v11, 1 }
  0x32   :  { %v47_v13 = vmax.f32 %v45_v11, %v46_v12 }
  0x34   :  { %v48_v14 = vsub.f32 %v39_v6, %v47_v13 }
  0x36   :  { %v49_v15 = vmul.f32 0.5, %v48_v14 }
  0x38   :  { %v50_v16 = vmul.f32 1.442695, %v49_v15 }
  0x3a   :  { %200 = vpow2.f32 %v50_v16 }
  0x44   :  { %v201_v17 = vpop.eup %200 }
  0x45   :  { %v52_v18 = vmul.f32 %v201_v17, %v201_v17 }
  0x47   :  { %v53_v19 = vsel %vm40_vm4, %v52_v18, 0.0 }
  0x48   :  { %v54_v20 = vrot.slane %v53_v19, 4 }
  0x4a   :  { %v55_v21 = vadd.f32 %v54_v20, %v53_v19 }
  0x4c   :  { %v56_v22 = vrot.slane %v55_v21, 2 }
  0x4e   :  { %v57_v23 = vadd.f32 %v56_v22, %v55_v21 }
  0x50   :  { %v58_v25 = vrot.slane %v57_v23, 1 }
  0x52   :  { %v59_v30 = vadd.f32 %v58_v25, %v57_v23 }
  0x54   :  { %202 = vlog2.f32 %v59_v30 }
  0x5e   :  { %v203_v36 = vpop.eup %202 }
  0x5f   :  { %v158_v37 = vmul.f32 0.6931472, %v203_v36 }
  0x61   :  { %v159_v38 = vmul.f32 0.5, %v158_v37 }
  0xff   :  { %v145_v24 = vpop.f32.mrb[0].mxu0 }
 0x100   :  { %v149_v26 = vmul.f32 %v201_v17, %v145_v24  ;;  %v194_v27 = vpop.f32.mrb[1].mxu0 }
 0x102   :  { %v150_v28 = vsel %vm40_vm4, %v149_v26, 0.0 }
 0x103   :  { %v151_v29 = vrot.slane %v150_v28, 4 }
 0x105   :  { %v152_v31 = vadd.f32 %v151_v29, %v150_v28 }
 0x107   :  { %v153_v32 = vrot.slane %v152_v31, 2 }
 0x109   :  { %v154_v33 = vadd.f32 %v153_v32, %v152_v31 }
 0x10b   :  { %v155_v34 = vrot.slane %v154_v33, 1 }
 0x10d   :  { %v156_v35 = vadd.f32 %v155_v34, %v154_v33 }
 0x10f   :  { %204 = vlog2.f32 %v156_v35 }
 0x119   :  { %v205_v39 = vpop.eup %204 }
 0x11a   :  { %v161_v40 = vmul.f32 0.6931472, %v205_v39 }
 0x11c   :  { %v162_v41 = vsub.f32 %v159_v38, %v161_v40 }
 0x11e   :  { %v163_v42 = vsel %vm40_vm4, %v162_v41, 0.0 }
 0x11f   :  { %164 = vadd.xlane.f32.xlu0 %v163_v42 }
 0x1ac   :  { %v165_v43 = vpop.xlane.xlu0 %164 }
 0x1ad   :  { %167 = vst.msk [vmem:[#allocation7] sm:$0x1] %vm166_vm5, %v165_v43 }
 0x1ae   :  { %261 = shalt.err (!%p258_p6)
}
 0x1af   :  { %s262_s14 = scalar_lea.hbm %s349_s3, 16 }
 0x1b0   :  { %p263_p7 = scmp.ne.s32.totalorder %s349_s3, %s262_s14  ;;  %p266_p8 = scmp.lt.u32.totalorder %s262_s14, %s349_s3 }
 0x1b2   :  { %p268_p9 = pnand %p266_p8, %p263_p7 }
 0x1b4   :  { %271 = shalt.err (!%p268_p9)
}
 0x1b5   :  { %177 = dma.vmem_to_hbm [thread:$0]  %s175_s2, 16, %s349_s3, [#allocation4]  }
 0x1b6   :  { %276 = dma.done.wait [#allocation4], 16  }
 0x1b7   :  { %277 = vsyncadd [#allocation4], 4294967280 }
 0x1b8   :  { %181 = vsyncpa [#allocation3], 1 }
 0x1b9   :  { %182 = vsyncpa [#allocation6], 1 }
 0x1ba   :  { %183 = vsyncpa [#allocation4], 1 }

</bundles_post_ra>
